<compile_context>
chip_gen: v7x
topology: tpu7x:2x2x1
jax: 0.10.0
libtpu: 0.0.40
codegen_flags: <defaults>
</compile_context>

<pallas_src>
import jax
import jax.numpy as jnp
from jax import lax
from jax.experimental import pallas as pl
from jax.experimental.pallas import tpu as pltpu


# Contract the trailing "in-features" axis of both operands: a @ b^T (MXU trans_b form).
_DN = (((1,), (1,)), ((), ()))


def perception_kernel(x_ref, w1_ref, b1_ref, w2_ref, b2_ref, w3_ref, b3_ref, o_ref):
    # x tile: (bt, D_in) in native layout. Each layer is y = x @ W^T + b, exactly as
    # PyTorch's nn.Linear. Accumulation is float32 regardless of storage dtype.
    h = lax.dot_general(x_ref[...], w1_ref[...], _DN,
                        preferred_element_type=jnp.float32) + b1_ref[...]
    h = jnp.maximum(h, 0.0)
    h = lax.dot_general(h.astype(w2_ref.dtype), w2_ref[...], _DN,
                        preferred_element_type=jnp.float32) + b2_ref[...]
    h = jnp.maximum(h, 0.0)
    z = lax.dot_general(h.astype(w3_ref.dtype), w3_ref[...], _DN,
                        preferred_element_type=jnp.float32) + b3_ref[...]
    o_ref[...] = z.astype(o_ref.dtype)  # native (bt, D_out) store — no wrapper transpose


def _round_up(n: int, m: int) -> int:
    return ((n + m - 1) // m) * m


def perception_forward(x, params, *, batch_tile=8192, param_dtype=None):
    """Forward pass of Perception.

    x:       (B, input_size) array.
    params:  PyTorch-native layout -- w_i: (out, in), b_i: (out,).
    param_dtype: optional storage dtype (e.g. jnp.bfloat16) for x + weights;
                 accumulation / biases / output stay float32.
    Returns: (B, repre_size) float32.
    """
    B, D_in = x.shape
    w1, b1 = params["w1"], params["b1"]
    w2, b2 = params["w2"], params["b2"]
    w3, b3 = params["w3"], params["b3"]
    H1, H2, D_out = w1.shape[0], w2.shape[0], w3.shape[0]
    assert w1.shape == (H1, D_in) and w2.shape == (H2, H1) and w3.shape == (D_out, H2)

    if param_dtype is not None:
        # Halve the dominant HBM read traffic (input + weights) if tolerated.
        x = x.astype(param_dtype)
        w1, w2, w3 = (w.astype(param_dtype) for w in (w1, w2, w3))

    # Biases as broadcastable (1, out) rows -- 8..32 floats, negligible.
    b1r = b1.reshape(1, H1).astype(jnp.float32)
    b2r = b2.reshape(1, H2).astype(jnp.float32)
    b3r = b3.reshape(1, D_out).astype(jnp.float32)

    # Tile the batch. Small batches run as a single invocation; larger batches use at
    # least two large "parallel" tiles so v7x's two TensorCores both get work.
    if B <= 1024:
        bt = B
    else:
        bt = min(batch_tile, max(256, _round_up(pl.cdiv(B, 2), 256)))
    grid = (pl.cdiv(B, bt),)  # ragged last tile handled by the pipeline (no jnp.pad)

    in_specs = [
        pl.BlockSpec((bt, D_in), lambda i: (i, 0)),    # x tile, native layout
        pl.BlockSpec((H1, D_in), lambda i: (0, 0)),    # w1 (constant -> DMA'd once)
        pl.BlockSpec((1, H1), lambda i: (0, 0)),       # b1
        pl.BlockSpec((H2, H1), lambda i: (0, 0)),      # w2
        pl.BlockSpec((1, H2), lambda i: (0, 0)),       # b2
        pl.BlockSpec((D_out, H2), lambda i: (0, 0)),   # w3
        pl.BlockSpec((1, D_out), lambda i: (0, 0)),    # b3
    ]
    out_spec = pl.BlockSpec((bt, D_out), lambda i: (i, 0))  # native (B, D_out) output

    return pl.pallas_call(
        perception_kernel,
        out_shape=jax.ShapeDtypeStruct((B, D_out), jnp.float32),
        grid_spec=pl.GridSpec(grid=grid, in_specs=in_specs, out_specs=out_spec),
        # Batch axis is embarrassingly parallel -> megacore sharding on v7x.
        # VMEM per step (~1.6 MiB at bt=8192 incl. double buffering) is far below the
        # default scoped limit on all of v5e/v6e/v7x, so no vmem_limit_bytes needed.
        compiler_params=pltpu.CompilerParams(dimension_semantics=("parallel",)),
    )(x, w1, b1r, w2, b2r, w3, b3r)


def init_perception_params(key, input_size, hidden_layers, repre_size):
    """Deterministic synthetic init, PyTorch-native layout: w (out, in), b (out,)."""
    sizes = [input_size, *hidden_layers, repre_size]
    params = {}
    for idx in range(len(sizes) - 1):
        key, kw, kb = jax.random.split(key, 3)
        fan_in, fan_out = sizes[idx], sizes[idx + 1]
        bound = 1.0 / jnp.sqrt(fan_in)
        params[f"w{idx + 1}"] = jax.random.uniform(
            kw, (fan_out, fan_in), jnp.float32, -bound, bound
        )
        params[f"b{idx + 1}"] = jax.random.uniform(
            kb, (fan_out,), jnp.float32, -bound, bound
        )
    return params


def perception_reference(x, params):
    """Pure-JAX reference matching PyTorch forward semantics (y = x @ W^T + b)."""
    h = jnp.maximum(x @ params["w1"].T + params["b1"], 0.0)
    h = jnp.maximum(h @ params["w2"].T + params["b2"], 0.0)
    return h @ params["w3"].T + params["b3"]


if __name__ == "__main__":
    input_size, hidden_layers, repre_size = 16, (32, 32), 8

    key = jax.random.PRNGKey(0)
    key, kp = jax.random.split(key)
    params = init_perception_params(kp, input_size, hidden_layers, repre_size)

    # 1) Small batch -> single kernel invocation (grid collapsed).
    key, kx = jax.random.split(key)
    x1 = jax.random.normal(kx, (256, input_size), jnp.float32)
    z1 = jax.block_until_ready(perception_forward(x1, params))
    assert z1.shape == (256, repre_size)
    assert jnp.allclose(z1, perception_reference(x1, params), atol=1e-4, rtol=1e-4), \
        "mismatch (single block)"

    # 2) Tiny batch (2 rows) -- degenerate single block, full-dim block shapes.
    key, kx = jax.random.split(key)
    x2 = jax.random.normal(kx, (2, input_size), jnp.float32)
    z2 = jax.block_until_ready(perception_forward(x2, params))
    assert z2.shape == (2, repre_size)
    assert jnp.allclose(z2, perception_reference(x2, params), atol=1e-4, rtol=1e-4), \
        "mismatch (tiny batch)"

    # 3) Ragged batch > 1024 -> two "parallel" tiles (megacore on v7x); the partial
    #    last block is masked by the pipeline (no jnp.pad copy anywhere).
    key, kx = jax.random.split(key)
    x3 = jax.random.normal(kx, (1500, input_size), jnp.float32)
    z3 = jax.block_until_ready(perception_forward(x3, params))
    assert z3.shape == (1500, repre_size)
    assert jnp.allclose(z3, perception_reference(x3, params), atol=1e-4, rtol=1e-4), \
        "mismatch (gridded / ragged)"

    # 4) Optional bf16 storage for x + weights (halved HBM reads), f32 accumulation.
    z4 = jax.block_until_ready(
        perception_forward(x3, params, param_dtype=jnp.bfloat16)
    )
    assert z4.shape == (1500, repre_size)
    assert jnp.allclose(z4, perception_reference(x3, params), atol=1e-1, rtol=1e-1), \
        "mismatch (bf16 storage)"

    print("KERNEL_OK")
</pallas_src>

<mosaic_0001>
module attributes {stable_mosaic.version = 11 : i64} {
  func.func @perception_kernel(%arg0: i32, %arg1: memref<256x16xf32, #tpu.memory_space<vmem>>, %arg2: memref<32x16xf32, #tpu.memory_space<vmem>>, %arg3: memref<1x32xf32, #tpu.memory_space<vmem>>, %arg4: memref<32x32xf32, #tpu.memory_space<vmem>>, %arg5: memref<1x32xf32, #tpu.memory_space<vmem>>, %arg6: memref<8x32xf32, #tpu.memory_space<vmem>>, %arg7: memref<1x8xf32, #tpu.memory_space<vmem>>, %arg8: memref<256x8xf32, #tpu.memory_space<vmem>>) attributes {dimension_semantics = [#tpu.dimension_semantics<parallel>], iteration_bounds = array<i64: 1>, scalar_prefetch = 0 : i64, scratch_operands = 0 : i64, tpu.core_type = #tpu.core_type<tc>, window_params = [{transform_indices = @transform_0, window_bounds = array<i64: 256, 16>}, {pipeline_mode = #tpu.pipeline_mode<synchronous>, transform_indices = @transform_1, window_bounds = array<i64: 32, 16>}, {pipeline_mode = #tpu.pipeline_mode<synchronous>, transform_indices = @transform_2, window_bounds = array<i64: 1, 32>}, {pipeline_mode = #tpu.pipeline_mode<synchronous>, transform_indices = @transform_3, window_bounds = array<i64: 32, 32>}, {pipeline_mode = #tpu.pipeline_mode<synchronous>, transform_indices = @transform_4, window_bounds = array<i64: 1, 32>}, {pipeline_mode = #tpu.pipeline_mode<synchronous>, transform_indices = @transform_5, window_bounds = array<i64: 8, 32>}, {pipeline_mode = #tpu.pipeline_mode<synchronous>, transform_indices = @transform_6, window_bounds = array<i64: 1, 8>}, {transform_indices = @transform_7, window_bounds = array<i64: 256, 8>}]} {
    %c0 = arith.constant 0 : index
    %c0_0 = arith.constant 0 : index
    %0 = vector.load %arg1[%c0, %c0_0] : memref<256x16xf32, #tpu.memory_space<vmem>>, vector<256x16xf32>
    %c0_1 = arith.constant 0 : index
    %c0_2 = arith.constant 0 : index
    %1 = vector.load %arg2[%c0_1, %c0_2] : memref<32x16xf32, #tpu.memory_space<vmem>>, vector<32x16xf32>
    %cst = arith.constant dense<0.000000e+00> : vector<256x32xf32>
    %2 = tpu.matmul %0, %1, %cst {dimension_numbers = #tpu.dot_dimension_numbers<[1], [1], [0], [0], [0, 0, 1, 0], [], []>} : vector<256x16xf32>, vector<32x16xf32>, vector<256x32xf32> -> vector<256x32xf32>
    %c0_3 = arith.constant 0 : index
    %c0_4 = arith.constant 0 : index
    %3 = vector.load %arg3[%c0_3, %c0_4] : memref<1x32xf32, #tpu.memory_space<vmem>>, vector<1x32xf32>
    %4 = vector.broadcast %3 : vector<1x32xf32> to vector<256x32xf32>
    %5 = arith.addf %2, %4 : vector<256x32xf32>
    %cst_5 = arith.constant 0.000000e+00 : f32
    %6 = vector.broadcast %cst_5 : f32 to vector<256x32xf32>
    %7 = arith.maximumf %5, %6 : vector<256x32xf32>
    %c0_6 = arith.constant 0 : index
    %c0_7 = arith.constant 0 : index
    %8 = vector.load %arg4[%c0_6, %c0_7] : memref<32x32xf32, #tpu.memory_space<vmem>>, vector<32x32xf32>
    %cst_8 = arith.constant dense<0.000000e+00> : vector<256x32xf32>
    %9 = tpu.matmul %7, %8, %cst_8 {dimension_numbers = #tpu.dot_dimension_numbers<[1], [1], [0], [0], [0, 0, 1, 0], [], []>} : vector<256x32xf32>, vector<32x32xf32>, vector<256x32xf32> -> vector<256x32xf32>
    %c0_9 = arith.constant 0 : index
    %c0_10 = arith.constant 0 : index
    %10 = vector.load %arg5[%c0_9, %c0_10] : memref<1x32xf32, #tpu.memory_space<vmem>>, vector<1x32xf32>
    %11 = vector.broadcast %10 : vector<1x32xf32> to vector<256x32xf32>
    %12 = arith.addf %9, %11 : vector<256x32xf32>
    %cst_11 = arith.constant 0.000000e+00 : f32
    %13 = vector.broadcast %cst_11 : f32 to vector<256x32xf32>
    %14 = arith.maximumf %12, %13 : vector<256x32xf32>
    %c0_12 = arith.constant 0 : index
    %c0_13 = arith.constant 0 : index
    %15 = vector.load %arg6[%c0_12, %c0_13] : memref<8x32xf32, #tpu.memory_space<vmem>>, vector<8x32xf32>
    %cst_14 = arith.constant dense<0.000000e+00> : vector<256x8xf32>
    %16 = tpu.matmul %14, %15, %cst_14 {dimension_numbers = #tpu.dot_dimension_numbers<[1], [1], [0], [0], [0, 0, 1, 0], [], []>} : vector<256x32xf32>, vector<8x32xf32>, vector<256x8xf32> -> vector<256x8xf32>
    %c0_15 = arith.constant 0 : index
    %c0_16 = arith.constant 0 : index
    %17 = vector.load %arg7[%c0_15, %c0_16] : memref<1x8xf32, #tpu.memory_space<vmem>>, vector<1x8xf32>
    %18 = vector.broadcast %17 : vector<1x8xf32> to vector<256x8xf32>
    %19 = arith.addf %16, %18 : vector<256x8xf32>
    %c0_17 = arith.constant 0 : index
    %c0_18 = arith.constant 0 : index
    %20 = vector.load %arg8[%c0_17, %c0_18] : memref<256x8xf32, #tpu.memory_space<vmem>>, vector<256x8xf32>
    tpu.vector_store %arg8[%c0_17, %c0_18], %19 {strides = array<i32>} : memref<256x8xf32, #tpu.memory_space<vmem>>, vector<256x8xf32>,
    return
  }
  func.func @transform_0(%arg0: i32) -> (i32, i32) {
    %c0_i32 = arith.constant 0 : i32
    %c0_i32_0 = arith.constant 0 : i32
    return %arg0, %c0_i32 : i32, i32
  }
  func.func @transform_1(%arg0: i32) -> (i32, i32) {
    %c0_i32 = arith.constant 0 : i32
    %c0_i32_0 = arith.constant 0 : i32
    %c0_i32_1 = arith.constant 0 : i32
    return %c0_i32, %c0_i32_0 : i32, i32
  }
  func.func @transform_2(%arg0: i32) -> (i32, i32) {
    %c0_i32 = arith.constant 0 : i32
    %c0_i32_0 = arith.constant 0 : i32
    %c0_i32_1 = arith.constant 0 : i32
    return %c0_i32, %c0_i32_0 : i32, i32
  }
  func.func @transform_3(%arg0: i32) -> (i32, i32) {
    %c0_i32 = arith.constant 0 : i32
    %c0_i32_0 = arith.constant 0 : i32
    %c0_i32_1 = arith.constant 0 : i32
    return %c0_i32, %c0_i32_0 : i32, i32
  }
  func.func @transform_4(%arg0: i32) -> (i32, i32) {
    %c0_i32 = arith.constant 0 : i32
    %c0_i32_0 = arith.constant 0 : i32
    %c0_i32_1 = arith.constant 0 : i32
    return %c0_i32, %c0_i32_0 : i32, i32
  }
  func.func @transform_5(%arg0: i32) -> (i32, i32) {
    %c0_i32 = arith.constant 0 : i32
    %c0_i32_0 = arith.constant 0 : i32
    %c0_i32_1 = arith.constant 0 : i32
    return %c0_i32, %c0_i32_0 : i32, i32
  }
  func.func @transform_6(%arg0: i32) -> (i32, i32) {
    %c0_i32 = arith.constant 0 : i32
    %c0_i32_0 = arith.constant 0 : i32
    %c0_i32_1 = arith.constant 0 : i32
    return %c0_i32, %c0_i32_0 : i32, i32
  }
  func.func @transform_7(%arg0: i32) -> (i32, i32) {
    %c0_i32 = arith.constant 0 : i32
    %c0_i32_0 = arith.constant 0 : i32
    return %arg0, %c0_i32 : i32, i32
  }
}

</mosaic_0001>

<bundles_post_ra>
// kernel: tpu_custom_call.1
= control target key start
LH: loop header
LB: loop body
LE: loop exit
PB: predicated region body
PF: predicated region fallthrough
CT: control target
= control target key end

     0   :  { %vm69_vm0 = vcmask 130048   ;;  %vm446_vm2 = vcmask 261120   ;;  %vm1144_vm4 = vcmask 64512   ;;  %s2147_s1 = inlined_call_operand.vmem [shape: f32[32,16], index: 1, kind: input, shape index: {}]   ;;  %s2148_s0 = inlined_call_operand.vmem [shape: f32[256,16], index: 0, kind: input, shape index: {}]   ;;  %s2149_s3 = inlined_call_operand.vmem [shape: f32[32,32], index: 3, kind: input, shape index: {}]   ;;  %s2150_s5 = inlined_call_operand.vmem [shape: f32[8,32], index: 5, kind: input, shape index: {}]   ;;  %s2151_s2 = inlined_call_operand.vmem [shape: f32[1,32], index: 2, kind: input, shape index: {}]   ;;  %s2152_s4 = inlined_call_operand.vmem [shape: f32[1,32], index: 4, kind: input, shape index: {}]   ;;  %s2153_s6 = inlined_call_operand.vmem [shape: f32[1,8], index: 6, kind: input, shape index: {}]   ;;  %s2154_s7 = inlined_call_operand.vmem [shape: f32[256,8], index: 7, kind: output, shape index: {}]  }
   0x1   :  { %v58_v0 = vld [vmem:[%s2147_s1] sm:$0xff]  ;;  %v59_v1 = vld [vmem:[%s2147_s1 + $0x8] sm:$0xff]  ;;  %vm1632_vm1 = vmpackc.low %vm69_vm0, %vm69_vm0 }
   0x2   :  { %v1556_v3 = vpack.c.bf16 %v59_v1, %v58_v0  ;;  %v60_v4 = vld [vmem:[%s2147_s1 + $0x10] sm:$0xff]  ;;  %v61_v5 = vld [vmem:[%s2147_s1 + $0x18] sm:$0xff]  ;;  %v26_v6 = vld [vmem:[%s2148_s0] sm:$0xff] }
   0x3   :  { %v1562_v7 = vpack.c.bf16 %v61_v5, %v60_v4  ;;  %1402 = vmatprep.mubr.msk.f32.mxu0 %vm69_vm0, %v26_v6  ;;  %v42_v8 = vld [vmem:[%s2148_s0 + $0x80] sm:$0xff]  ;;  %v436_v10 = vld [vmem:[%s2149_s3 + $0x8] sm:$0xff]  ;;  %vm1674_vm3 = vmpackc.low %vm446_vm2, %vm446_vm2 }
   0x4   :  { %1558 = vmatprep.subr.msk.bf16.mxu0 %vm1632_vm1, %v1556_v3  ;;  %1580 = vmatprep.subr.msk.bf16.mxu1 %vm1632_vm1, %v1556_v3  ;;  %v435_v9 = vld [vmem:[%s2149_s3] sm:$0xff]  ;;  %v437_v13 = vld [vmem:[%s2149_s3 + $0x10] sm:$0xff]  ;;  %v438_v14 = vld [vmem:[%s2149_s3 + $0x18] sm:$0xff] }
   0x5   :  { %1561 = vmatpush3.bf16.xpose.msk.msra.mxu0 %vm1632_vm1, %v1556_v3  ;;  %1582 = vmatpush3.bf16.xpose.msk.msra.mxu1 %vm1632_vm1, %v1556_v3  ;;  %v1568_v11 = vpack.c.bf16 %v436_v10, %v435_v9  ;;  %v27_v15 = vld [vmem:[%s2148_s0 + $0x8] sm:$0xff]  ;;  %v28_v17 = vld [vmem:[%s2148_s0 + $0x10] sm:$0xff]  ;;  %v1574_v19 = vpack.c.bf16 %v438_v14, %v437_v13  ;;  %v29_v20 = vld [vmem:[%s2148_s0 + $0x18] sm:$0xff] }
   0x6   :  { %1564 = vmatprep.subr.msk.bf16.mxu0 %vm1632_vm1, %v1562_v7  ;;  %1581 = vmatprep.subr.msk.bf16.mxu1 %vm1632_vm1, %v1562_v7  ;;  %v43_v16 = vld [vmem:[%s2148_s0 + $0x88] sm:$0xff]  ;;  %v44_v18 = vld [vmem:[%s2148_s0 + $0x90] sm:$0xff]  ;;  %v45_v21 = vld [vmem:[%s2148_s0 + $0x98] sm:$0xff] }
   0x7   :  { %1426 = vmatprep.mubr.msk.f32.mxu1 %vm69_vm0, %v42_v8  ;;  %v30_v22 = vld [vmem:[%s2148_s0 + $0x20] sm:$0xff]  ;;  %v31_v24 = vld [vmem:[%s2148_s0 + $0x28] sm:$0xff]  ;;  %v32_v26 = vld [vmem:[%s2148_s0 + $0x30] sm:$0xff] }
   0x8   :  { %v46_v23 = vld [vmem:[%s2148_s0 + $0xa0] sm:$0xff]  ;;  %v47_v25 = vld [vmem:[%s2148_s0 + $0xa8] sm:$0xff]  ;;  %v48_v27 = vld [vmem:[%s2148_s0 + $0xb0] sm:$0xff] }
   0x9   :  { %v33_v28 = vld [vmem:[%s2148_s0 + $0x38] sm:$0xff]  ;;  %v34_v30 = vld [vmem:[%s2148_s0 + $0x40] sm:$0xff]  ;;  %v35_v32 = vld [vmem:[%s2148_s0 + $0x48] sm:$0xff] }
   0xa   :  { %v49_v29 = vld [vmem:[%s2148_s0 + $0xb8] sm:$0xff]  ;;  %v50_v31 = vld [vmem:[%s2148_s0 + $0xc0] sm:$0xff]  ;;  %v51_v33 = vld [vmem:[%s2148_s0 + $0xc8] sm:$0xff] }
   0xb   :  { %v36_v34 = vld [vmem:[%s2148_s0 + $0x50] sm:$0xff]  ;;  %v37_v36 = vld [vmem:[%s2148_s0 + $0x58] sm:$0xff]  ;;  %v38_v38 = vld [vmem:[%s2148_s0 + $0x60] sm:$0xff] }
   0xc   :  { %v52_v35 = vld [vmem:[%s2148_s0 + $0xd0] sm:$0xff]  ;;  %v53_v37 = vld [vmem:[%s2148_s0 + $0xd8] sm:$0xff]  ;;  %v54_v39 = vld [vmem:[%s2148_s0 + $0xe0] sm:$0xff] }
   0xd   :  { %1567 = vmatpush3.bf16.xpose.msk.msra.mxu0 %vm1632_vm1, %v1562_v7  ;;  %1583 = vmatpush3.bf16.xpose.msk.msra.mxu1 %vm1632_vm1, %v1562_v7  ;;  %v39_v40 = vld [vmem:[%s2148_s0 + $0x68] sm:$0xff]  ;;  %v40_v42 = vld [vmem:[%s2148_s0 + $0x70] sm:$0xff]  ;;  %v41_v44 = vld [vmem:[%s2148_s0 + $0x78] sm:$0xff] }
   0xe   :  { %1570 = vmatprep.subr.msk.bf16.mxu1 %vm1674_vm3, %v1568_v11  ;;  %v55_v41 = vld [vmem:[%s2148_s0 + $0xe8] sm:$0xff]  ;;  %v56_v43 = vld [vmem:[%s2148_s0 + $0xf0] sm:$0xff]  ;;  %v57_v45 = vld [vmem:[%s2148_s0 + $0xf8] sm:$0xff] }
   0xf   :  { %v812_v46 = vld [vmem:[%s2150_s5] sm:$0xff] }
  0x10   :  { %1506 = vmatprep.subr.msk.mxu0 %vm446_vm2, %v812_v46  ;;  %v1820_v47 = vld [vmem:[%s2151_s2] ss:$0 sm:$0xff] }
  0x14   :  { %1403 = vmatmul.mubr.msk.f32.vlgmr.msra.gmra.mrb[0].mxu0 %vm69_vm0, %v27_v15  ;;  %1427 = vmatmul.mubr.msk.f32.vlgmr.msra.gmra.mrb[0].mxu1 %vm69_vm0, %v43_v16 }
  0x15   :  { %1405 = vmatprep.mubr.msk.f32.mxu0 %vm69_vm0, %v28_v17  ;;  %1429 = vmatprep.mubr.msk.f32.mxu1 %vm69_vm0, %v44_v18 }
  0x16   :  { %1573 = vmatpush3.bf16.xpose.msk.msra.mxu1 %vm1674_vm3, %v1568_v11  ;;  %1507 = vmatpush3.xpose.msk.msra.mxu0 %vm446_vm2, %v812_v46 }
  0x17   :  { %1576 = vmatprep.subr.msk.bf16.mxu1 %vm1674_vm3, %v1574_v19 }
  0x18   :  { %1406 = vmatmul.mubr.msk.f32.gmra.mrb[2].mxu0 %vm69_vm0, %v29_v20  ;;  %1430 = vmatmul.mubr.msk.f32.gmra.mrb[2].mxu1 %vm69_vm0, %v45_v21 }
  0x19   :  { %1408 = vmatprep.mubr.msk.f32.mxu0 %vm69_vm0, %v30_v22  ;;  %1432 = vmatprep.mubr.msk.f32.mxu1 %vm69_vm0, %v46_v23 }
  0x1c   :  { %1409 = vmatmul.mubr.msk.f32.gmra.mrb[4].mxu0 %vm69_vm0, %v31_v24  ;;  %1433 = vmatmul.mubr.msk.f32.gmra.mrb[4].mxu1 %vm69_vm0, %v47_v25 }
  0x1d   :  { %1411 = vmatprep.mubr.msk.f32.mxu0 %vm69_vm0, %v32_v26  ;;  %1435 = vmatprep.mubr.msk.f32.mxu1 %vm69_vm0, %v48_v27 }
  0x1e   :  { %1579 = vmatpush3.bf16.xpose.msk.msra.mxu1 %vm1674_vm3, %v1574_v19 }
  0x20   :  { %1412 = vmatmul.mubr.msk.f32.gmra.mrb[6].mxu0 %vm69_vm0, %v33_v28  ;;  %1436 = vmatmul.mubr.msk.f32.gmra.mrb[6].mxu1 %vm69_vm0, %v49_v29 }
  0x21   :  { %1414 = vmatprep.mubr.msk.f32.mxu0 %vm69_vm0, %v34_v30  ;;  %1438 = vmatprep.mubr.msk.f32.mxu1 %vm69_vm0, %v50_v31 }
  0x24   :  { %1415 = vmatmul.mubr.msk.f32.gmra.mrb[8].mxu0 %vm69_vm0, %v35_v32  ;;  %1439 = vmatmul.mubr.msk.f32.gmra.mrb[8].mxu1 %vm69_vm0, %v51_v33 }
  0x25   :  { %1417 = vmatprep.mubr.msk.f32.mxu0 %vm69_vm0, %v36_v34  ;;  %1441 = vmatprep.mubr.msk.f32.mxu1 %vm69_vm0, %v52_v35 }
  0x28   :  { %1418 = vmatmul.mubr.msk.f32.gmra.mrb[10].mxu0 %vm69_vm0, %v37_v36  ;;  %1442 = vmatmul.mubr.msk.f32.gmra.mrb[10].mxu1 %vm69_vm0, %v53_v37 }
  0x29   :  { %1420 = vmatprep.mubr.msk.f32.mxu0 %vm69_vm0, %v38_v38  ;;  %1444 = vmatprep.mubr.msk.f32.mxu1 %vm69_vm0, %v54_v39 }
  0x2c   :  { %1421 = vmatmul.mubr.msk.f32.gmra.mrb[12].mxu0 %vm69_vm0, %v39_v40  ;;  %1445 = vmatmul.mubr.msk.f32.gmra.mrb[12].mxu1 %vm69_vm0, %v55_v41 }
  0x2d   :  { %1423 = vmatprep.mubr.msk.f32.mxu0 %vm69_vm0, %v40_v42  ;;  %1447 = vmatprep.mubr.msk.f32.mxu1 %vm69_vm0, %v56_v43 }
  0x30   :  { %1424 = vmatmul.mubr.msk.f32.gmra.mrb[14].mxu0 %vm69_vm0, %v41_v44  ;;  %1448 = vmatmul.mubr.msk.f32.gmra.mrb[14].mxu1 %vm69_vm0, %v57_v45 }
  0xe7   :  { %v1404_v48 = vpop.f32.mrb[0].mxu0  ;;  %v1822_v49 = vpop.f32.mrb[0].mxu1 }
  0xe8   :  { %v250_v50 = vadd.f32 %v1404_v48, %v1820_v47  ;;  %v244_v51 = vpop.f32.mrb[1].mxu0  ;;  %v1825_v52 = vpop.f32.mrb[1].mxu1 }
  0xe9   :  { %v245_v53 = vadd.f32 %v1820_v47, %v244_v51  ;;  %v325_v40 = vadd.f32 %v1820_v47, %v1825_v52  ;;  %v330_v52 = vadd.f32 %v1822_v49, %v1820_v47 }
  0xea   :  { %v404_v57 = vmax.f32 %v250_v50, 0.0 }
  0xeb   :  { %v403_v54 = vmax.f32 %v245_v53, 0.0  ;;  %v1407_v55 = vpop.f32.mrb[2].mxu0  ;;  %v1828_v56 = vpop.f32.mrb[2].mxu1  ;;  %v419_v50 = vmax.f32 %v325_v40, 0.0 }
  0xec   :  { %v260_v58 = vadd.f32 %v1407_v55, %v1820_v47  ;;  %v254_v59 = vpop.f32.mrb[3].mxu0  ;;  %v1831_v60 = vpop.f32.mrb[3].mxu1 }
  0xed   :  { %v255_v61 = vadd.f32 %v1820_v47, %v254_v59  ;;  %1458 = vmatprep.mubr.msk.f32.mxu1 %vm446_vm2, %v403_v54  ;;  %v335_v51 = vadd.f32 %v1820_v47, %v1831_v60 }
  0xee   :  { %1459 = vmatmul.mubr.msk.f32.vlgmr.msra.gmra.mrb[16].mxu1 %vm446_vm2, %v404_v57  ;;  %v406_v1 = vmax.f32 %v260_v58, 0.0  ;;  %v420_v57 = vmax.f32 %v330_v52, 0.0  ;;  %v340_v58 = vadd.f32 %v1828_v56, %v1820_v47 }
  0xef   :  { %v405_v62 = vmax.f32 %v255_v61, 0.0  ;;  %v1410_v63 = vpop.f32.mrb[4].mxu0  ;;  %v1836_v0 = vpop.f32.mrb[4].mxu1  ;;  %v421_v54 = vmax.f32 %v335_v51, 0.0 }
  0xf0   :  { %v270_v2 = vadd.f32 %v1410_v63, %v1820_v47  ;;  %v264_v3 = vpop.f32.mrb[5].mxu0  ;;  %v1839_v4 = vpop.f32.mrb[5].mxu1  ;;  %v422_v60 = vmax.f32 %v340_v58, 0.0  ;;  %v350_v61 = vadd.f32 %v1836_v0, %v1820_v47 }
  0xf1   :  { %v265_v5 = vadd.f32 %v1820_v47, %v264_v3  ;;  %1461 = vmatprep.mubr.msk.f32.mxu1 %vm446_vm2, %v405_v62  ;;  %v345_v55 = vadd.f32 %v1820_v47, %v1839_v4 }
  0xf2   :  { %1462 = vmatmul.mubr.msk.f32.gmra.mrb[18].mxu1 %vm446_vm2, %v406_v1  ;;  %v408_v9 = vmax.f32 %v270_v2, 0.0  ;;  %v424_v1 = vmax.f32 %v350_v61, 0.0 }
  0xf3   :  { %v407_v6 = vmax.f32 %v265_v5, 0.0  ;;  %v1413_v7 = vpop.f32.mrb[6].mxu0  ;;  %v1844_v8 = vpop.f32.mrb[6].mxu1  ;;  %v423_v59 = vmax.f32 %v345_v55, 0.0 }
  0xf4   :  { %v280_v10 = vadd.f32 %v1413_v7, %v1820_v47  ;;  %v274_v11 = vpop.f32.mrb[7].mxu0  ;;  %v354_v12 = vpop.f32.mrb[7].mxu1  ;;  %v360_v56 = vadd.f32 %v1844_v8, %v1820_v47 }
  0xf5   :  { %v275_v13 = vadd.f32 %v1820_v47, %v274_v11  ;;  %1464 = vmatprep.mubr.msk.f32.mxu1 %vm446_vm2, %v407_v6  ;;  %v355_v49 = vadd.f32 %v1820_v47, %v354_v12 }
  0xf6   :  { %1465 = vmatmul.mubr.msk.f32.gmra.mrb[20].mxu1 %vm446_vm2, %v408_v9  ;;  %v410_v17 = vmax.f32 %v280_v10, 0.0  ;;  %v426_v4 = vmax.f32 %v360_v56, 0.0 }
  0xf7   :  { %v409_v14 = vmax.f32 %v275_v13, 0.0  ;;  %v1416_v15 = vpop.f32.mrb[8].mxu0  ;;  %v1850_v16 = vpop.f32.mrb[8].mxu1  ;;  %v425_v62 = vmax.f32 %v355_v49, 0.0 }
  0xf8   :  { %v290_v18 = vadd.f32 %v1416_v15, %v1820_v47  ;;  %v284_v19 = vpop.f32.mrb[9].mxu0  ;;  %v364_v20 = vpop.f32.mrb[9].mxu1  ;;  %v370_v0 = vadd.f32 %v1850_v16, %v1820_v47 }
  0xf9   :  { %v285_v21 = vadd.f32 %v1820_v47, %v284_v19  ;;  %1467 = vmatprep.mubr.msk.f32.mxu1 %vm446_vm2, %v409_v14  ;;  %v365_v63 = vadd.f32 %v1820_v47, %v364_v20 }
  0xfa   :  { %1468 = vmatmul.mubr.msk.f32.gmra.mrb[22].mxu1 %vm446_vm2, %v410_v17  ;;  %v412_v25 = vmax.f32 %v290_v18, 0.0  ;;  %v428_v7 = vmax.f32 %v370_v0, 0.0  ;;  %v1916_v17 = vld [vmem:[%s2152_s4] ss:$0 sm:$0xff] }
  0xfb   :  { %v411_v22 = vmax.f32 %v285_v21, 0.0  ;;  %v1419_v23 = vpop.f32.mrb[10].mxu0  ;;  %v1856_v24 = vpop.f32.mrb[10].mxu1  ;;  %v427_v2 = vmax.f32 %v365_v63, 0.0 }
  0xfc   :  { %v300_v26 = vadd.f32 %v1419_v23, %v1820_v47  ;;  %v294_v27 = vpop.f32.mrb[11].mxu0  ;;  %v374_v28 = vpop.f32.mrb[11].mxu1  ;;  %v380_v8 = vadd.f32 %v1856_v24, %v1820_v47 }
  0xfd   :  { %v295_v29 = vadd.f32 %v1820_v47, %v294_v27  ;;  %1470 = vmatprep.mubr.msk.f32.mxu1 %vm446_vm2, %v411_v22  ;;  %v375_v3 = vadd.f32 %v1820_v47, %v374_v28 }
  0xfe   :  { %1471 = vmatmul.mubr.msk.f32.gmra.mrb[24].mxu1 %vm446_vm2, %v412_v25  ;;  %v414_v33 = vmax.f32 %v300_v26, 0.0  ;;  %v430_v11 = vmax.f32 %v380_v8, 0.0 }
  0xff   :  { %v413_v30 = vmax.f32 %v295_v29, 0.0  ;;  %v1422_v31 = vpop.f32.mrb[12].mxu0  ;;  %v1446_v32 = vpop.f32.mrb[12].mxu1  ;;  %v429_v5 = vmax.f32 %v375_v3, 0.0 }
 0x100   :  { %v310_v34 = vadd.f32 %v1422_v31, %v1820_v47  ;;  %v304_v35 = vpop.f32.mrb[13].mxu0  ;;  %v384_v36 = vpop.f32.mrb[13].mxu1  ;;  %v390_v12 = vadd.f32 %v1446_v32, %v1820_v47 }
 0x101   :  { %v305_v37 = vadd.f32 %v1820_v47, %v304_v35  ;;  %1473 = vmatprep.mubr.msk.f32.mxu1 %vm446_vm2, %v413_v30  ;;  %v385_v6 = vadd.f32 %v1820_v47, %v384_v36 }
 0x102   :  { %1474 = vmatmul.mubr.msk.f32.gmra.mrb[26].mxu1 %vm446_vm2, %v414_v33  ;;  %v416_v42 = vmax.f32 %v310_v34, 0.0  ;;  %v432_v14 = vmax.f32 %v390_v12, 0.0 }
 0x103   :  { %v415_v38 = vmax.f32 %v305_v37, 0.0  ;;  %v1425_v39 = vpop.f32.mrb[14].mxu0  ;;  %v1449_v41 = vpop.f32.mrb[14].mxu1  ;;  %v431_v9 = vmax.f32 %v385_v6, 0.0 }
 0x104   :  { %v320_v43 = vadd.f32 %v1425_v39, %v1820_v47  ;;  %v314_v44 = vpop.f32.mrb[15].mxu0  ;;  %v394_v45 = vpop.f32.mrb[15].mxu1  ;;  %v400_v15 = vadd.f32 %v1449_v41, %v1820_v47 }
 0x105   :  { %v315_v46 = vadd.f32 %v1820_v47, %v314_v44  ;;  %1476 = vmatprep.mubr.msk.f32.mxu1 %vm446_vm2, %v415_v38  ;;  %v395_v10 = vadd.f32 %v1820_v47, %v394_v45 }
 0x106   :  { %1477 = vmatmul.mubr.msk.f32.gmra.mrb[28].mxu1 %vm446_vm2, %v416_v42  ;;  %v418_v53 = vmax.f32 %v320_v43, 0.0  ;;  %v434_v16 = vmax.f32 %v400_v15, 0.0 }
 0x107   :  { %v417_v48 = vmax.f32 %v315_v46, 0.0  ;;  %v433_v13 = vmax.f32 %v395_v10, 0.0 }
 0x109   :  { %1479 = vmatprep.mubr.msk.f32.mxu1 %vm446_vm2, %v417_v48 }
 0x10a   :  { %1480 = vmatmul.mubr.msk.f32.gmra.mrb[30].mxu1 %vm446_vm2, %v418_v53 }
 0x10b   :  { %1482 = vmatprep.mubr.msk.f32.mxu1 %vm446_vm2, %v419_v50 }
 0x10e   :  { %1483 = vmatmul.mubr.msk.f32.gmra.mrb[32].mxu1 %vm446_vm2, %v420_v57 }
 0x10f   :  { %1485 = vmatprep.mubr.msk.f32.mxu1 %vm446_vm2, %v421_v54 }
 0x112   :  { %1486 = vmatmul.mubr.msk.f32.gmra.mrb[34].mxu1 %vm446_vm2, %v422_v60 }
 0x113   :  { %1488 = vmatprep.mubr.msk.f32.mxu1 %vm446_vm2, %v423_v59 }
 0x116   :  { %1489 = vmatmul.mubr.msk.f32.gmra.mrb[36].mxu1 %vm446_vm2, %v424_v1 }
 0x117   :  { %1491 = vmatprep.mubr.msk.f32.mxu1 %vm446_vm2, %v425_v62 }
 0x11a   :  { %1492 = vmatmul.mubr.msk.f32.gmra.mrb[38].mxu1 %vm446_vm2, %v426_v4 }
 0x11b   :  { %1494 = vmatprep.mubr.msk.f32.mxu1 %vm446_vm2, %v427_v2 }
 0x11e   :  { %1495 = vmatmul.mubr.msk.f32.gmra.mrb[40].mxu1 %vm446_vm2, %v428_v7 }
 0x11f   :  { %1497 = vmatprep.mubr.msk.f32.mxu1 %vm446_vm2, %v429_v5 }
 0x122   :  { %1498 = vmatmul.mubr.msk.f32.gmra.mrb[42].mxu1 %vm446_vm2, %v430_v11 }
 0x123   :  { %1500 = vmatprep.mubr.msk.f32.mxu1 %vm446_vm2, %v431_v9 }
 0x126   :  { %1501 = vmatmul.mubr.msk.f32.gmra.mrb[44].mxu1 %vm446_vm2, %v432_v14 }
 0x127   :  { %1503 = vmatprep.mubr.msk.f32.mxu1 %vm446_vm2, %v433_v13 }
 0x12a   :  { %1504 = vmatmul.mubr.msk.f32.gmra.mrb[46].mxu1 %vm446_vm2, %v434_v16 }
 0x1c1   :  { %v1460_v18 = vpop.f32.mrb[16].mxu1 }
 0x1c2   :  { %v627_v19 = vadd.f32 %v1460_v18, %v1916_v17  ;;  %v621_v20 = vpop.f32.mrb[17].mxu1 }
 0x1c3   :  { %v622_v21 = vadd.f32 %v1916_v17, %v621_v20 }
 0x1c4   :  { %v781_v23 = vmax.f32 %v627_v19, 0.0 }
 0x1c5   :  { %v780_v22 = vmax.f32 %v622_v21, 0.0  ;;  %v1463_v47 = vpop.f32.mrb[18].mxu1 }
 0x1c6   :  { %v637_v24 = vadd.f32 %v1463_v47, %v1916_v17  ;;  %v631_v25 = vpop.f32.mrb[19].mxu1 }
 0x1c7   :  { %v632_v26 = vadd.f32 %v1916_v17, %v631_v25  ;;  %1508 = vmatprep.mubr.msk.f32.mxu0 %vm446_vm2, %v780_v22 }
 0x1c8   :  { %1509 = vmatmul.mubr.msk.f32.vlgmr.msra.gmra.mrb[16].mxu0 %vm446_vm2, %v781_v23  ;;  %v783_v29 = vmax.f32 %v637_v24, 0.0 }
 0x1c9   :  { %v782_v27 = vmax.f32 %v632_v26, 0.0  ;;  %v1466_v28 = vpop.f32.mrb[20].mxu1 }
 0x1ca   :  { %v647_v30 = vadd.f32 %v1466_v28, %v1916_v17  ;;  %v641_v31 = vpop.f32.mrb[21].mxu1 }
 0x1cb   :  { %v642_v32 = vadd.f32 %v1916_v17, %v641_v31  ;;  %1511 = vmatprep.mubr.msk.f32.mxu0 %vm446_vm2, %v782_v27 }
 0x1cc   :  { %1512 = vmatmul.mubr.msk.f32.gmra.mrb[18].mxu0 %vm446_vm2, %v783_v29  ;;  %v785_v35 = vmax.f32 %v647_v30, 0.0 }
 0x1cd   :  { %v784_v33 = vmax.f32 %v642_v32, 0.0  ;;  %v1469_v34 = vpop.f32.mrb[22].mxu1 }
 0x1ce   :  { %v657_v36 = vadd.f32 %v1469_v34, %v1916_v17  ;;  %v651_v37 = vpop.f32.mrb[23].mxu1 }
 0x1cf   :  { %v652_v38 = vadd.f32 %v1916_v17, %v651_v37  ;;  %1514 = vmatprep.mubr.msk.f32.mxu0 %vm446_vm2, %v784_v33 }
 0x1d0   :  { %1515 = vmatmul.mubr.msk.f32.gmra.mrb[20].mxu0 %vm446_vm2, %v785_v35  ;;  %v787_v41 = vmax.f32 %v657_v36, 0.0 }
 0x1d1   :  { %v786_v39 = vmax.f32 %v652_v38, 0.0  ;;  %v1472_v40 = vpop.f32.mrb[24].mxu1 }
 0x1d2   :  { %v667_v42 = vadd.f32 %v1472_v40, %v1916_v17  ;;  %v661_v43 = vpop.f32.mrb[25].mxu1 }
 0x1d3   :  { %v662_v44 = vadd.f32 %v1916_v17, %v661_v43  ;;  %1517 = vmatprep.mubr.msk.f32.mxu0 %vm446_vm2, %v786_v39 }
 0x1d4   :  { %1518 = vmatmul.mubr.msk.f32.gmra.mrb[22].mxu0 %vm446_vm2, %v787_v41  ;;  %v789_v48 = vmax.f32 %v667_v42, 0.0 }
 0x1d5   :  { %v788_v45 = vmax.f32 %v662_v44, 0.0  ;;  %v1475_v46 = vpop.f32.mrb[26].mxu1 }
 0x1d6   :  { %v677_v50 = vadd.f32 %v1475_v46, %v1916_v17  ;;  %v671_v51 = vpop.f32.mrb[27].mxu1 }
 0x1d7   :  { %v672_v53 = vadd.f32 %v1916_v17, %v671_v51  ;;  %1520 = vmatprep.mubr.msk.f32.mxu0 %vm446_vm2, %v788_v45 }
 0x1d8   :  { %1521 = vmatmul.mubr.msk.f32.gmra.mrb[24].mxu0 %vm446_vm2, %v789_v48  ;;  %v791_v55 = vmax.f32 %v677_v50, 0.0 }
 0x1d9   :  { %v790_v52 = vmax.f32 %v672_v53, 0.0  ;;  %v1478_v54 = vpop.f32.mrb[28].mxu1  ;;  %v1985_v53 = vld [vmem:[%s2153_s6] ss:$0 sm:$0xff] }
 0x1da   :  { %v687_v57 = vadd.f32 %v1478_v54, %v1916_v17  ;;  %v681_v58 = vpop.f32.mrb[29].mxu1 }
 0x1db   :  { %v682_v59 = vadd.f32 %v1916_v17, %v681_v58  ;;  %1523 = vmatprep.mubr.msk.f32.mxu0 %vm446_vm2, %v790_v52 }
 0x1dc   :  { %1524 = vmatmul.mubr.msk.f32.gmra.mrb[26].mxu0 %vm446_vm2, %v791_v55  ;;  %v793_v61 = vmax.f32 %v687_v57, 0.0 }
 0x1dd   :  { %v792_v49 = vmax.f32 %v682_v59, 0.0  ;;  %v1481_v60 = vpop.f32.mrb[30].mxu1 }
 0x1de   :  { %v697_v62 = vadd.f32 %v1481_v60, %v1916_v17  ;;  %v691_v63 = vpop.f32.mrb[31].mxu1 }
 0x1df   :  { %v692_v1 = vadd.f32 %v1916_v17, %v691_v63  ;;  %1526 = vmatprep.mubr.msk.f32.mxu0 %vm446_vm2, %v792_v49 }
 0x1e0   :  { %1527 = vmatmul.mubr.msk.f32.gmra.mrb[28].mxu0 %vm446_vm2, %v793_v61  ;;  %v795_v3 = vmax.f32 %v697_v62, 0.0 }
 0x1e1   :  { %v794_v56 = vmax.f32 %v692_v1, 0.0  ;;  %v1484_v2 = vpop.f32.mrb[32].mxu1 }
 0x1e2   :  { %v707_v4 = vadd.f32 %v1484_v2, %v1916_v17  ;;  %v701_v0 = vpop.f32.mrb[33].mxu1 }
 0x1e3   :  { %v702_v5 = vadd.f32 %v1916_v17, %v701_v0  ;;  %1529 = vmatprep.mubr.msk.f32.mxu0 %vm446_vm2, %v794_v56 }
 0x1e4   :  { %1530 = vmatmul.mubr.msk.f32.gmra.mrb[30].mxu0 %vm446_vm2, %v795_v3  ;;  %v797_v8 = vmax.f32 %v707_v4, 0.0 }
 0x1e5   :  { %v796_v6 = vmax.f32 %v702_v5, 0.0  ;;  %v1487_v7 = vpop.f32.mrb[34].mxu1 }
 0x1e6   :  { %v717_v9 = vadd.f32 %v1487_v7, %v1916_v17  ;;  %v711_v10 = vpop.f32.mrb[35].mxu1 }
 0x1e7   :  { %v712_v11 = vadd.f32 %v1916_v17, %v711_v10  ;;  %1532 = vmatprep.mubr.msk.f32.mxu0 %vm446_vm2, %v796_v6 }
 0x1e8   :  { %1533 = vmatmul.mubr.msk.f32.gmra.mrb[32].mxu0 %vm446_vm2, %v797_v8  ;;  %v799_v14 = vmax.f32 %v717_v9, 0.0 }
 0x1e9   :  { %v798_v12 = vmax.f32 %v712_v11, 0.0  ;;  %v1490_v13 = vpop.f32.mrb[36].mxu1 }
 0x1ea   :  { %v727_v15 = vadd.f32 %v1490_v13, %v1916_v17  ;;  %v721_v16 = vpop.f32.mrb[37].mxu1 }
 0x1eb   :  { %v722_v18 = vadd.f32 %v1916_v17, %v721_v16  ;;  %1535 = vmatprep.mubr.msk.f32.mxu0 %vm446_vm2, %v798_v12 }
 0x1ec   :  { %1536 = vmatmul.mubr.msk.f32.gmra.mrb[34].mxu0 %vm446_vm2, %v799_v14  ;;  %v801_v21 = vmax.f32 %v727_v15, 0.0 }
 0x1ed   :  { %v800_v19 = vmax.f32 %v722_v18, 0.0  ;;  %v1493_v20 = vpop.f32.mrb[38].mxu1 }
 0x1ee   :  { %v737_v22 = vadd.f32 %v1493_v20, %v1916_v17  ;;  %v731_v47 = vpop.f32.mrb[39].mxu1 }
 0x1ef   :  { %v732_v23 = vadd.f32 %v1916_v17, %v731_v47  ;;  %1538 = vmatprep.mubr.msk.f32.mxu0 %vm446_vm2, %v800_v19 }
 0x1f0   :  { %1539 = vmatmul.mubr.msk.f32.gmra.mrb[36].mxu0 %vm446_vm2, %v801_v21  ;;  %v803_v26 = vmax.f32 %v737_v22, 0.0 }
 0x1f1   :  { %v802_v24 = vmax.f32 %v732_v23, 0.0  ;;  %v1496_v25 = vpop.f32.mrb[40].mxu1 }
 0x1f2   :  { %v747_v27 = vadd.f32 %v1496_v25, %v1916_v17  ;;  %v741_v28 = vpop.f32.mrb[41].mxu1 }
 0x1f3   :  { %v742_v29 = vadd.f32 %v1916_v17, %v741_v28  ;;  %1541 = vmatprep.mubr.msk.f32.mxu0 %vm446_vm2, %v802_v24 }
 0x1f4   :  { %1542 = vmatmul.mubr.msk.f32.gmra.mrb[38].mxu0 %vm446_vm2, %v803_v26  ;;  %v805_v32 = vmax.f32 %v747_v27, 0.0 }
 0x1f5   :  { %v804_v30 = vmax.f32 %v742_v29, 0.0  ;;  %v1499_v31 = vpop.f32.mrb[42].mxu1 }
 0x1f6   :  { %v757_v33 = vadd.f32 %v1499_v31, %v1916_v17  ;;  %v751_v34 = vpop.f32.mrb[43].mxu1 }
 0x1f7   :  { %v752_v35 = vadd.f32 %v1916_v17, %v751_v34  ;;  %1544 = vmatprep.mubr.msk.f32.mxu0 %vm446_vm2, %v804_v30 }
 0x1f8   :  { %1545 = vmatmul.mubr.msk.f32.gmra.mrb[40].mxu0 %vm446_vm2, %v805_v32  ;;  %v807_v38 = vmax.f32 %v757_v33, 0.0 }
 0x1f9   :  { %v806_v36 = vmax.f32 %v752_v35, 0.0  ;;  %v1502_v37 = vpop.f32.mrb[44].mxu1 }
 0x1fa   :  { %v767_v39 = vadd.f32 %v1502_v37, %v1916_v17  ;;  %v761_v40 = vpop.f32.mrb[45].mxu1 }
 0x1fb   :  { %v762_v41 = vadd.f32 %v1916_v17, %v761_v40  ;;  %1547 = vmatprep.mubr.msk.f32.mxu0 %vm446_vm2, %v806_v36 }
 0x1fc   :  { %1548 = vmatmul.mubr.msk.f32.gmra.mrb[42].mxu0 %vm446_vm2, %v807_v38  ;;  %v809_v44 = vmax.f32 %v767_v39, 0.0 }
 0x1fd   :  { %v808_v42 = vmax.f32 %v762_v41, 0.0  ;;  %v1505_v43 = vpop.f32.mrb[46].mxu1 }
 0x1fe   :  { %v777_v45 = vadd.f32 %v1505_v43, %v1916_v17  ;;  %v771_v46 = vpop.f32.mrb[47].mxu1 }
 0x1ff   :  { %v772_v48 = vadd.f32 %v1916_v17, %v771_v46  ;;  %1550 = vmatprep.mubr.msk.f32.mxu0 %vm446_vm2, %v808_v42 }
 0x200   :  { %1551 = vmatmul.mubr.msk.f32.gmra.mrb[44].mxu0 %vm446_vm2, %v809_v44  ;;  %v811_v51 = vmax.f32 %v777_v45, 0.0 }
 0x201   :  { %v810_v50 = vmax.f32 %v772_v48, 0.0 }
 0x203   :  { %1553 = vmatprep.mubr.msk.f32.mxu0 %vm446_vm2, %v810_v50 }
 0x204   :  { %1554 = vmatmul.mubr.msk.f32.gmra.mrb[46].mxu0 %vm446_vm2, %v811_v51 }
 0x29b   :  { %v1510_v52 = vpop.f32.mrb[16].mxu0 }
 0x29c   :  { %v991_v54 = vadd.f32 %v1510_v52, %v1985_v53  ;;  %v985_v17 = vpop.f32.mrb[17].mxu0 }
 0x29d   :  { %v986_v55 = vadd.f32 %v1985_v53, %v985_v17 }
 0x29e   :  { %1146 = vst.msk [vmem:[%s2154_s7 + $0x8] sm:$0xff] %vm1144_vm4, %v991_v54 }
 0x29f   :  { %1145 = vst.msk [vmem:[%s2154_s7] sm:$0xff] %vm1144_vm4, %v986_v55  ;;  %v1513_v57 = vpop.f32.mrb[18].mxu0 }
 0x2a0   :  { %v1001_v58 = vadd.f32 %v1513_v57, %v1985_v53  ;;  %v995_v59 = vpop.f32.mrb[19].mxu0 }
 0x2a1   :  { %v996_v49 = vadd.f32 %v1985_v53, %v995_v59 }
 0x2a2   :  { %1148 = vst.msk [vmem:[%s2154_s7 + $0x18] sm:$0xff] %vm1144_vm4, %v1001_v58 }
 0x2a3   :  { %1147 = vst.msk [vmem:[%s2154_s7 + $0x10] sm:$0xff] %vm1144_vm4, %v996_v49  ;;  %v1516_v60 = vpop.f32.mrb[20].mxu0 }
 0x2a4   :  { %v1011_v61 = vadd.f32 %v1516_v60, %v1985_v53  ;;  %v1005_v62 = vpop.f32.mrb[21].mxu0 }
 0x2a5   :  { %v1006_v63 = vadd.f32 %v1985_v53, %v1005_v62 }
 0x2a6   :  { %1150 = vst.msk [vmem:[%s2154_s7 + $0x28] sm:$0xff] %vm1144_vm4, %v1011_v61 }
 0x2a7   :  { %1149 = vst.msk [vmem:[%s2154_s7 + $0x20] sm:$0xff] %vm1144_vm4, %v1006_v63  ;;  %v1519_v1 = vpop.f32.mrb[22].mxu0 }
 0x2a8   :  { %v1021_v56 = vadd.f32 %v1519_v1, %v1985_v53  ;;  %v1015_v2 = vpop.f32.mrb[23].mxu0 }
 0x2a9   :  { %v1016_v3 = vadd.f32 %v1985_v53, %v1015_v2 }
 0x2aa   :  { %1152 = vst.msk [vmem:[%s2154_s7 + $0x38] sm:$0xff] %vm1144_vm4, %v1021_v56 }
 0x2ab   :  { %1151 = vst.msk [vmem:[%s2154_s7 + $0x30] sm:$0xff] %vm1144_vm4, %v1016_v3  ;;  %v1522_v4 = vpop.f32.mrb[24].mxu0 }
 0x2ac   :  { %v1031_v0 = vadd.f32 %v1522_v4, %v1985_v53  ;;  %v1025_v5 = vpop.f32.mrb[25].mxu0 }
 0x2ad   :  { %v1026_v6 = vadd.f32 %v1985_v53, %v1025_v5 }
 0x2ae   :  { %1154 = vst.msk [vmem:[%s2154_s7 + $0x48] sm:$0xff] %vm1144_vm4, %v1031_v0 }
 0x2af   :  { %1153 = vst.msk [vmem:[%s2154_s7 + $0x40] sm:$0xff] %vm1144_vm4, %v1026_v6  ;;  %v1525_v7 = vpop.f32.mrb[26].mxu0 }
 0x2b0   :  { %v1041_v8 = vadd.f32 %v1525_v7, %v1985_v53  ;;  %v1035_v9 = vpop.f32.mrb[27].mxu0 }
 0x2b1   :  { %v1036_v10 = vadd.f32 %v1985_v53, %v1035_v9 }
 0x2b2   :  { %1156 = vst.msk [vmem:[%s2154_s7 + $0x58] sm:$0xff] %vm1144_vm4, %v1041_v8 }
 0x2b3   :  { %1155 = vst.msk [vmem:[%s2154_s7 + $0x50] sm:$0xff] %vm1144_vm4, %v1036_v10  ;;  %v1528_v11 = vpop.f32.mrb[28].mxu0 }
 0x2b4   :  { %v1051_v12 = vadd.f32 %v1528_v11, %v1985_v53  ;;  %v1045_v13 = vpop.f32.mrb[29].mxu0 }
 0x2b5   :  { %v1046_v14 = vadd.f32 %v1985_v53, %v1045_v13 }
 0x2b6   :  { %1158 = vst.msk [vmem:[%s2154_s7 + $0x68] sm:$0xff] %vm1144_vm4, %v1051_v12 }
 0x2b7   :  { %1157 = vst.msk [vmem:[%s2154_s7 + $0x60] sm:$0xff] %vm1144_vm4, %v1046_v14  ;;  %v1531_v15 = vpop.f32.mrb[30].mxu0 }
 0x2b8   :  { %v1061_v16 = vadd.f32 %v1531_v15, %v1985_v53  ;;  %v1055_v18 = vpop.f32.mrb[31].mxu0 }
 0x2b9   :  { %v1056_v19 = vadd.f32 %v1985_v53, %v1055_v18 }
 0x2ba   :  { %1160 = vst.msk [vmem:[%s2154_s7 + $0x78] sm:$0xff] %vm1144_vm4, %v1061_v16 }
 0x2bb   :  { %1159 = vst.msk [vmem:[%s2154_s7 + $0x70] sm:$0xff] %vm1144_vm4, %v1056_v19  ;;  %v1534_v20 = vpop.f32.mrb[32].mxu0 }
 0x2bc   :  { %v1071_v21 = vadd.f32 %v1534_v20, %v1985_v53  ;;  %v1065_v22 = vpop.f32.mrb[33].mxu0 }
 0x2bd   :  { %v1066_v47 = vadd.f32 %v1985_v53, %v1065_v22 }
 0x2be   :  { %1162 = vst.msk [vmem:[%s2154_s7 + $0x88] sm:$0xff] %vm1144_vm4, %v1071_v21 }
 0x2bf   :  { %1161 = vst.msk [vmem:[%s2154_s7 + $0x80] sm:$0xff] %vm1144_vm4, %v1066_v47  ;;  %v1537_v23 = vpop.f32.mrb[34].mxu0 }
 0x2c0   :  { %v1081_v24 = vadd.f32 %v1537_v23, %v1985_v53  ;;  %v1075_v25 = vpop.f32.mrb[35].mxu0 }
 0x2c1   :  { %v1076_v26 = vadd.f32 %v1985_v53, %v1075_v25 }
 0x2c2   :  { %1164 = vst.msk [vmem:[%s2154_s7 + $0x98] sm:$0xff] %vm1144_vm4, %v1081_v24 }
 0x2c3   :  { %1163 = vst.msk [vmem:[%s2154_s7 + $0x90] sm:$0xff] %vm1144_vm4, %v1076_v26  ;;  %v1540_v27 = vpop.f32.mrb[36].mxu0 }
 0x2c4   :  { %v1091_v28 = vadd.f32 %v1540_v27, %v1985_v53  ;;  %v1085_v29 = vpop.f32.mrb[37].mxu0 }
 0x2c5   :  { %v1086_v30 = vadd.f32 %v1985_v53, %v1085_v29 }
 0x2c6   :  { %1166 = vst.msk [vmem:[%s2154_s7 + $0xa8] sm:$0xff] %vm1144_vm4, %v1091_v28 }
 0x2c7   :  { %1165 = vst.msk [vmem:[%s2154_s7 + $0xa0] sm:$0xff] %vm1144_vm4, %v1086_v30  ;;  %v1543_v31 = vpop.f32.mrb[38].mxu0 }
 0x2c8   :  { %v1101_v32 = vadd.f32 %v1543_v31, %v1985_v53  ;;  %v1095_v33 = vpop.f32.mrb[39].mxu0 }
 0x2c9   :  { %v1096_v34 = vadd.f32 %v1985_v53, %v1095_v33 }
 0x2ca   :  { %1168 = vst.msk [vmem:[%s2154_s7 + $0xb8] sm:$0xff] %vm1144_vm4, %v1101_v32 }
 0x2cb   :  { %1167 = vst.msk [vmem:[%s2154_s7 + $0xb0] sm:$0xff] %vm1144_vm4, %v1096_v34  ;;  %v1546_v35 = vpop.f32.mrb[40].mxu0 }
 0x2cc   :  { %v1111_v36 = vadd.f32 %v1546_v35, %v1985_v53  ;;  %v1105_v37 = vpop.f32.mrb[41].mxu0 }
 0x2cd   :  { %v1106_v38 = vadd.f32 %v1985_v53, %v1105_v37 }
 0x2ce   :  { %1170 = vst.msk [vmem:[%s2154_s7 + $0xc8] sm:$0xff] %vm1144_vm4, %v1111_v36 }
 0x2cf   :  { %1169 = vst.msk [vmem:[%s2154_s7 + $0xc0] sm:$0xff] %vm1144_vm4, %v1106_v38  ;;  %v1549_v39 = vpop.f32.mrb[42].mxu0 }
 0x2d0   :  { %v1121_v40 = vadd.f32 %v1549_v39, %v1985_v53  ;;  %v1115_v41 = vpop.f32.mrb[43].mxu0 }
 0x2d1   :  { %v1116_v42 = vadd.f32 %v1985_v53, %v1115_v41 }
 0x2d2   :  { %1172 = vst.msk [vmem:[%s2154_s7 + $0xd8] sm:$0xff] %vm1144_vm4, %v1121_v40 }
 0x2d3   :  { %1171 = vst.msk [vmem:[%s2154_s7 + $0xd0] sm:$0xff] %vm1144_vm4, %v1116_v42  ;;  %v1552_v43 = vpop.f32.mrb[44].mxu0 }
 0x2d4   :  { %v1131_v44 = vadd.f32 %v1552_v43, %v1985_v53  ;;  %v1125_v45 = vpop.f32.mrb[45].mxu0 }
 0x2d5   :  { %v1126_v46 = vadd.f32 %v1985_v53, %v1125_v45 }
 0x2d6   :  { %1174 = vst.msk [vmem:[%s2154_s7 + $0xe8] sm:$0xff] %vm1144_vm4, %v1131_v44 }
 0x2d7   :  { %1173 = vst.msk [vmem:[%s2154_s7 + $0xe0] sm:$0xff] %vm1144_vm4, %v1126_v46  ;;  %v1555_v48 = vpop.f32.mrb[46].mxu0 }
 0x2d8   :  { %v1141_v50 = vadd.f32 %v1555_v48, %v1985_v53  ;;  %v1135_v51 = vpop.f32.mrb[47].mxu0 }
 0x2d9   :  { %v1136_v52 = vadd.f32 %v1985_v53, %v1135_v51 }
 0x2da   :  { %1176 = vst.msk [vmem:[%s2154_s7 + $0xf8] sm:$0xff] %vm1144_vm4, %v1141_v50 }
 0x2db   :  { %1175 = vst.msk [vmem:[%s2154_s7 + $0xf0] sm:$0xff] %vm1144_vm4, %v1136_v52 }

</bundles_post_ra>
